<compile_context>
chip_gen: v6e
topology: v6e:2x2x1
jax: 0.10.0
libtpu: 0.0.40
codegen_flags: <defaults>
</compile_context>

<pallas_src>
import functools

import jax
import jax.numpy as jnp
from jax.experimental import pallas as pl
from jax.experimental.pallas import tpu as pltpu

HIDDEN = 256
OUT_LANES = 128    # lane-dense fused head output: [probs | value | zero pad]
MAX_TM = 1024      # max batch-tile rows (working set ~10 MiB << any VMEM)


def _round_up(x, m):
    return ((x + m - 1) // m) * m


def _choose_tm(batch):
    """Batch tile: as large as possible (<=1024) but >=2 grid steps when we can.

    >=2 steps lets the "parallel" batch axis shard across v7x's two
    TensorCores; large tiles amortize the ~0.35us/step overhead on v5e/v6e.
    """
    if batch <= 8:
        return 8
    return min(MAX_TM, _round_up(-(-batch // 2), 8))


def _ppo_kernel(action_dim, hidden,
                z_ref, w1_ref, b1_ref, w2_ref, b2_ref,
                wh_ref, bh_ref, wo_ref, bo_ref,
                slab_ref):
    cdt = w1_ref.dtype                       # MXU operand dtype (bf16 or f32)
    x = z_ref[...].astype(cdt)

    # trunk: fc1 -> relu -> fc2 -> relu
    h1 = jnp.dot(x, w1_ref[...], preferred_element_type=jnp.float32) + b1_ref[...]
    h1 = jnp.maximum(h1, 0.0)
    feat = jnp.dot(h1.astype(cdt), w2_ref[...],
                   preferred_element_type=jnp.float32) + b2_ref[...]
    feat = jnp.maximum(feat, 0.0)

    # fused first layer of BOTH heads: [TM,256] @ [256,512] (= wa1 | wc1)
    heads = jnp.dot(feat.astype(cdt), wh_ref[...],
                    preferred_element_type=jnp.float32) + bh_ref[...]
    heads = jnp.maximum(heads, 0.0)

    # fused block-diagonal output layer: [TM,512] @ [512,128] in ONE MXU pass.
    # lanes [0:action_dim] = actor logits, lane [action_dim] = critic value,
    # remaining lanes = 0 (zero-padded weight/bias columns).
    fused = jnp.dot(heads.astype(cdt), wo_ref[...],
                    preferred_element_type=jnp.float32) + bo_ref[...]

    lane = jax.lax.broadcasted_iota(jnp.int32, fused.shape, dimension=1)
    is_logit = lane < action_dim

    # masked softmax over the logit lanes only (keep where-based masking: the
    # value/pad lanes may overflow in exp() but are never selected).
    neg_big = jnp.float32(-1e30)
    logits = jnp.where(is_logit, fused, neg_big)
    m = jnp.max(logits, axis=-1, keepdims=True)
    e = jnp.where(is_logit, jnp.exp(fused - m), 0.0)
    d = jnp.sum(e, axis=-1, keepdims=True)
    r = pl.reciprocal(d, approx=True)        # EUP vrcp (free slot)
    r = r * (2.0 - d * r)                    # one Newton step -> f32 accuracy
    probs = e * r

    # single lane-dense output slab:
    #   lanes [0:hidden]                       -> features
    #   lanes [hidden : hidden+action_dim]     -> action probs
    #   lane  [hidden+action_dim]              -> critic value
    #   remaining lanes                        -> 0
    slab_ref[:, :hidden] = feat.astype(slab_ref.dtype)
    slab_ref[:, hidden:] = jnp.where(is_logit, probs, fused).astype(slab_ref.dtype)


def prepare_fused_params(params, weight_dtype=jnp.bfloat16):
    """Fuse/pad/cast the weights once (host-side).

    weight_dtype=jnp.bfloat16 (default) halves weight-HBM traffic and doubles
    MXU rate; use jnp.float32 for exact f32 semantics. Biases stay f32.
    """
    H = params["w1"].shape[1]
    action_dim = params["wa2"].shape[1]
    assert action_dim < OUT_LANES, "action_dim must fit in one 128-lane slab"

    # heads' first layers side-by-side
    wh = jnp.concatenate([params["wa1"], params["wc1"]], axis=1)      # [H, 2H]
    bh = jnp.concatenate([params["ba1"], params["bc1"]], axis=1)      # [1, 2H]

    # block-diagonal, zero-padded output layer -> one [2H, 128] weight
    wo = jnp.zeros((2 * H, OUT_LANES), jnp.float32)
    wo = wo.at[:H, :action_dim].set(params["wa2"])                    # logits
    wo = wo.at[H:, action_dim].set(params["wc2"][:, 0])               # value
    bo = jnp.zeros((1, OUT_LANES), jnp.float32)
    bo = bo.at[:, :action_dim].set(params["ba2"])
    bo = bo.at[0, action_dim].set(params["bc2"][0, 0])

    wd = jnp.dtype(weight_dtype)
    return dict(w1=params["w1"].astype(wd), b1=params["b1"],
                w2=params["w2"].astype(wd), b2=params["b2"],
                wh=wh.astype(wd), bh=bh,
                wo=wo.astype(wd), bo=bo,
                action_dim=action_dim)


def ppo_actor_critic_forward(z_x, fp):
    """Runs the PPOActorCritic forward pass in a single Pallas kernel.

    Args:
      z_x: [B, causal_dim] float32
      fp:  fused params from prepare_fused_params
    Returns:
      (action_probs [B, action_dim], state_value [B], features [B, 256])
    """
    B, z_dim = z_x.shape
    H = fp["w1"].shape[1]
    action_dim = fp["action_dim"]
    slab_w = H + OUT_LANES

    # --- batch tiling: large tiles, >=2 grid steps when possible, host pad
    tm = _choose_tm(B)
    steps = pl.cdiv(B, tm)
    Bp = steps * tm
    if Bp != B:
        z_x = jnp.pad(z_x, ((0, Bp - B), (0, 0)))   # full blocks, no ragged edge
    grid = (steps,)

    def wspec(shape):
        # constant block index -> block-invariant: weights stay resident in
        # VMEM and are DMA'd once, not per grid step.
        return pl.BlockSpec(shape, lambda i: (0, 0))

    # --- cost estimate + explicit VMEM budget (v5e default scoped VMEM = 16MiB)
    w_item = jnp.dtype(fp["w1"].dtype).itemsize
    weight_elems = z_dim * H + H * H + H * (2 * H) + (2 * H) * OUT_LANES
    weight_bytes = w_item * weight_elems + 4 * (H + H + 2 * H + OUT_LANES)
    act_tile_bytes = 4 * tm * (z_dim + slab_w)                 # in + out tiles
    interm_bytes = 4 * tm * (H + H + 2 * H + OUT_LANES)        # h1/feat/heads/fused
    vmem_needed = 2 * act_tile_bytes + 2 * weight_bytes + interm_bytes
    vmem_limit = int(min(max(4 * vmem_needed, 32 << 20), 48 << 20))

    flops = 2 * Bp * weight_elems
    bytes_io = 4 * Bp * (z_dim + slab_w)
    cost = pl.CostEstimate(flops=flops,
                           transcendentals=Bp * OUT_LANES,
                           bytes_accessed=weight_bytes + bytes_io)

    slab = pl.pallas_call(
        functools.partial(_ppo_kernel, action_dim, H),
        out_shape=jax.ShapeDtypeStruct((Bp, slab_w), jnp.float32),
        grid_spec=pltpu.PrefetchScalarGridSpec(
            num_scalar_prefetch=0,
            grid=grid,
            in_specs=[
                pl.BlockSpec((tm, z_dim), lambda i: (i, 0)),
                wspec((z_dim, H)), wspec((1, H)),
                wspec((H, H)), wspec((1, H)),
                wspec((H, 2 * H)), wspec((1, 2 * H)),
                wspec((2 * H, OUT_LANES)), wspec((1, OUT_LANES)),
            ],
            out_specs=pl.BlockSpec((tm, slab_w), lambda i: (i, 0)),
        ),
        compiler_params=pltpu.CompilerParams(
            dimension_semantics=("parallel",),
            vmem_limit_bytes=vmem_limit),
        cost_estimate=cost,
    )(z_x, fp["w1"], fp["b1"], fp["w2"], fp["b2"],
      fp["wh"], fp["bh"], fp["wo"], fp["bo"])

    # pure slicing glue in the wrapper (lane-dense slab -> user-facing outputs)
    feats = slab[:B, :H]
    probs = slab[:B, H:H + action_dim]
    value = slab[:B, H + action_dim]
    return probs, value, feats


def init_params(key, z_dim, action_dim, hidden=HIDDEN):
    """Deterministic synthetic initialization (PyTorch-like uniform fan-in scaling)."""
    keys = jax.random.split(key, 12)

    def lin(kw, kb, fan_in, fan_out):
        bound = 1.0 / jnp.sqrt(jnp.float32(fan_in))
        w = jax.random.uniform(kw, (fan_in, fan_out), jnp.float32, -bound, bound)
        b = jax.random.uniform(kb, (1, fan_out), jnp.float32, -bound, bound)
        return w, b

    w1, b1 = lin(keys[0], keys[1], z_dim, hidden)
    w2, b2 = lin(keys[2], keys[3], hidden, hidden)
    wa1, ba1 = lin(keys[4], keys[5], hidden, hidden)
    wa2, ba2 = lin(keys[6], keys[7], hidden, action_dim)
    wc1, bc1 = lin(keys[8], keys[9], hidden, hidden)
    wc2, bc2 = lin(keys[10], keys[11], hidden, 1)

    return dict(w1=w1, b1=b1, w2=w2, b2=b2,
                wa1=wa1, ba1=ba1, wa2=wa2, ba2=ba2,
                wc1=wc1, bc1=bc1, wc2=wc2, bc2=bc2)


def reference_forward(z_x, p):
    """Pure-JAX f32 reference for correctness checking."""
    h1 = jnp.maximum(z_x @ p["w1"] + p["b1"], 0.0)
    feat = jnp.maximum(h1 @ p["w2"] + p["b2"], 0.0)
    a1 = jnp.maximum(feat @ p["wa1"] + p["ba1"], 0.0)
    logits = a1 @ p["wa2"] + p["ba2"]
    probs = jax.nn.softmax(logits, axis=-1)
    c1 = jnp.maximum(feat @ p["wc1"] + p["bc1"], 0.0)
    val = (c1 @ p["wc2"] + p["bc2"])[:, 0]
    return probs, val, feat


if __name__ == "__main__":
    key = jax.random.PRNGKey(0)
    k_params, k_input, k_input2 = jax.random.split(key, 3)

    batch = 8
    z_dim = 32       # causal_dim
    action_dim = 4

    params = init_params(k_params, z_dim, action_dim)
    z_x = jax.random.normal(k_input, (batch, z_dim), dtype=jnp.float32)
    r_probs, r_value, r_feats = reference_forward(z_x, params)

    # --- exact-precision path (f32 weights): tight check vs f32 reference
    fp_f32 = prepare_fused_params(params, weight_dtype=jnp.float32)
    probs, value, feats = ppo_actor_critic_forward(z_x, fp_f32)
    jax.block_until_ready((probs, value, feats))
    assert probs.shape == (batch, action_dim)
    assert value.shape == (batch,)
    assert feats.shape == (batch, HIDDEN)
    assert jnp.allclose(probs, r_probs, atol=1e-5, rtol=1e-5)
    assert jnp.allclose(value, r_value, atol=1e-5, rtol=1e-5)
    assert jnp.allclose(feats, r_feats, atol=1e-5, rtol=1e-5)

    # --- default fast path (bf16 weights; halves weight-DMA): loose check
    fp_bf16 = prepare_fused_params(params)  # bfloat16 weights
    pb, vb, fb = ppo_actor_critic_forward(z_x, fp_bf16)
    jax.block_until_ready((pb, vb, fb))
    assert bool(jnp.all(jnp.isfinite(pb))) and bool(jnp.all(jnp.isfinite(vb)))
    assert jnp.allclose(pb, r_probs, atol=5e-2, rtol=5e-2)
    assert jnp.allclose(vb, r_value, atol=5e-2, rtol=5e-2)
    assert jnp.allclose(fb, r_feats, atol=5e-2, rtol=5e-2)

    # --- ragged batch: exercises host padding + a 2-step ("parallel") grid
    batch2 = 20
    z2 = jax.random.normal(k_input2, (batch2, z_dim), dtype=jnp.float32)
    p2, v2, f2 = ppo_actor_critic_forward(z2, fp_f32)
    jax.block_until_ready((p2, v2, f2))
    rp2, rv2, rf2 = reference_forward(z2, params)
    assert p2.shape == (batch2, action_dim) and v2.shape == (batch2,)
    assert jnp.allclose(p2, rp2, atol=1e-5, rtol=1e-5)
    assert jnp.allclose(v2, rv2, atol=1e-5, rtol=1e-5)
    assert jnp.allclose(f2, rf2, atol=1e-5, rtol=1e-5)

    print("KERNEL_OK")
</pallas_src>

<mosaic_0001>
module attributes {stable_mosaic.version = 11 : i64} {
  func.func @_ppo_kernel(%arg0: i32, %arg1: memref<8x32xf32, #tpu.memory_space<vmem>>, %arg2: memref<32x256xf32, #tpu.memory_space<vmem>>, %arg3: memref<1x256xf32, #tpu.memory_space<vmem>>, %arg4: memref<256x256xf32, #tpu.memory_space<vmem>>, %arg5: memref<1x256xf32, #tpu.memory_space<vmem>>, %arg6: memref<256x512xf32, #tpu.memory_space<vmem>>, %arg7: memref<1x512xf32, #tpu.memory_space<vmem>>, %arg8: memref<512x128xf32, #tpu.memory_space<vmem>>, %arg9: memref<1x128xf32, #tpu.memory_space<vmem>>, %arg10: memref<8x384xf32, #tpu.memory_space<vmem>>) attributes {dimension_semantics = [#tpu.dimension_semantics<parallel>], iteration_bounds = array<i64: 1>, scalar_prefetch = 0 : i64, scratch_operands = 0 : i64, tpu.core_type = #tpu.core_type<tc>, window_params = [{transform_indices = @transform_0, window_bounds = array<i64: 8, 32>}, {pipeline_mode = #tpu.pipeline_mode<synchronous>, transform_indices = @transform_1, window_bounds = array<i64: 32, 256>}, {pipeline_mode = #tpu.pipeline_mode<synchronous>, transform_indices = @transform_2, window_bounds = array<i64: 1, 256>}, {pipeline_mode = #tpu.pipeline_mode<synchronous>, transform_indices = @transform_3, window_bounds = array<i64: 256, 256>}, {pipeline_mode = #tpu.pipeline_mode<synchronous>, transform_indices = @transform_4, window_bounds = array<i64: 1, 256>}, {pipeline_mode = #tpu.pipeline_mode<synchronous>, transform_indices = @transform_5, window_bounds = array<i64: 256, 512>}, {pipeline_mode = #tpu.pipeline_mode<synchronous>, transform_indices = @transform_6, window_bounds = array<i64: 1, 512>}, {pipeline_mode = #tpu.pipeline_mode<synchronous>, transform_indices = @transform_7, window_bounds = array<i64: 512, 128>}, {pipeline_mode = #tpu.pipeline_mode<synchronous>, transform_indices = @transform_8, window_bounds = array<i64: 1, 128>}, {transform_indices = @transform_9, window_bounds = array<i64: 8, 384>}]} {
    %c0 = arith.constant 0 : index
    %c0_0 = arith.constant 0 : index
    %0 = vector.load %arg1[%c0, %c0_0] : memref<8x32xf32, #tpu.memory_space<vmem>>, vector<8x32xf32>
    %c0_1 = arith.constant 0 : index
    %c0_2 = arith.constant 0 : index
    %1 = vector.load %arg2[%c0_1, %c0_2] : memref<32x256xf32, #tpu.memory_space<vmem>>, vector<32x256xf32>
    %cst = arith.constant dense<0.000000e+00> : vector<8x256xf32>
    %2 = tpu.matmul %0, %1, %cst {dimension_numbers = #tpu.dot_dimension_numbers<[1], [0], [0], [1], [0, 0, 1, 1], [], []>} : vector<8x32xf32>, vector<32x256xf32>, vector<8x256xf32> -> vector<8x256xf32>
    %c0_3 = arith.constant 0 : index
    %c0_4 = arith.constant 0 : index
    %3 = vector.load %arg3[%c0_3, %c0_4] : memref<1x256xf32, #tpu.memory_space<vmem>>, vector<1x256xf32>
    %4 = vector.broadcast %3 : vector<1x256xf32> to vector<8x256xf32>
    %5 = arith.addf %2, %4 : vector<8x256xf32>
    %cst_5 = arith.constant 0.000000e+00 : f32
    %6 = vector.broadcast %cst_5 : f32 to vector<8x256xf32>
    %7 = arith.maximumf %5, %6 : vector<8x256xf32>
    %c0_6 = arith.constant 0 : index
    %c0_7 = arith.constant 0 : index
    %8 = vector.load %arg4[%c0_6, %c0_7] : memref<256x256xf32, #tpu.memory_space<vmem>>, vector<256x256xf32>
    %cst_8 = arith.constant dense<0.000000e+00> : vector<8x256xf32>
    %9 = tpu.matmul %7, %8, %cst_8 {dimension_numbers = #tpu.dot_dimension_numbers<[1], [0], [0], [1], [0, 0, 1, 1], [], []>} : vector<8x256xf32>, vector<256x256xf32>, vector<8x256xf32> -> vector<8x256xf32>
    %c0_9 = arith.constant 0 : index
    %c0_10 = arith.constant 0 : index
    %10 = vector.load %arg5[%c0_9, %c0_10] : memref<1x256xf32, #tpu.memory_space<vmem>>, vector<1x256xf32>
    %11 = vector.broadcast %10 : vector<1x256xf32> to vector<8x256xf32>
    %12 = arith.addf %9, %11 : vector<8x256xf32>
    %cst_11 = arith.constant 0.000000e+00 : f32
    %13 = vector.broadcast %cst_11 : f32 to vector<8x256xf32>
    %14 = arith.maximumf %12, %13 : vector<8x256xf32>
    %c0_12 = arith.constant 0 : index
    %c0_13 = arith.constant 0 : index
    %15 = vector.load %arg6[%c0_12, %c0_13] : memref<256x512xf32, #tpu.memory_space<vmem>>, vector<256x512xf32>
    %cst_14 = arith.constant dense<0.000000e+00> : vector<8x512xf32>
    %16 = tpu.matmul %14, %15, %cst_14 {dimension_numbers = #tpu.dot_dimension_numbers<[1], [0], [0], [1], [0, 0, 1, 1], [], []>} : vector<8x256xf32>, vector<256x512xf32>, vector<8x512xf32> -> vector<8x512xf32>
    %c0_15 = arith.constant 0 : index
    %c0_16 = arith.constant 0 : index
    %17 = vector.load %arg7[%c0_15, %c0_16] : memref<1x512xf32, #tpu.memory_space<vmem>>, vector<1x512xf32>
    %18 = vector.broadcast %17 : vector<1x512xf32> to vector<8x512xf32>
    %19 = arith.addf %16, %18 : vector<8x512xf32>
    %cst_17 = arith.constant 0.000000e+00 : f32
    %20 = vector.broadcast %cst_17 : f32 to vector<8x512xf32>
    %21 = arith.maximumf %19, %20 : vector<8x512xf32>
    %c0_18 = arith.constant 0 : index
    %c0_19 = arith.constant 0 : index
    %22 = vector.load %arg8[%c0_18, %c0_19] : memref<512x128xf32, #tpu.memory_space<vmem>>, vector<512x128xf32>
    %cst_20 = arith.constant dense<0.000000e+00> : vector<8x128xf32>
    %23 = tpu.matmul %21, %22, %cst_20 {dimension_numbers = #tpu.dot_dimension_numbers<[1], [0], [0], [1], [0, 0, 1, 1], [], []>} : vector<8x512xf32>, vector<512x128xf32>, vector<8x128xf32> -> vector<8x128xf32>
    %c0_21 = arith.constant 0 : index
    %c0_22 = arith.constant 0 : index
    %24 = vector.load %arg9[%c0_21, %c0_22] : memref<1x128xf32, #tpu.memory_space<vmem>>, vector<1x128xf32>
    %25 = vector.broadcast %24 : vector<1x128xf32> to vector<8x128xf32>
    %26 = arith.addf %23, %25 : vector<8x128xf32>
    %27 = tpu.iota {dimensions = array<i32: 1>} : vector<8x128xi32>
    %c4_i32 = arith.constant 4 : i32
    %28 = vector.broadcast %c4_i32 : i32 to vector<8x128xi32>
    %29 = arith.cmpi slt, %27, %28 : vector<8x128xi32>
    %cst_23 = arith.constant -1.000000e+30 : f32
    %30 = vector.broadcast %cst_23 : f32 to vector<8x128xf32>
    %31 = arith.select %29, %26, %30 : vector<8x128xi1>, vector<8x128xf32>
    %cst_24 = arith.constant dense<0xFF800000> : vector<8xf32>
    %32 = vector.multi_reduction <maximumf>, %31, %cst_24 [1] : vector<8x128xf32> to vector<8xf32>
    %33 = vector.shape_cast %32 : vector<8xf32> to vector<8x1xf32>
    %34 = vector.broadcast %33 : vector<8x1xf32> to vector<8x128xf32>
    %35 = arith.subf %26, %34 : vector<8x128xf32>
    %36 = math.exp %35 : vector<8x128xf32>
    %cst_25 = arith.constant 0.000000e+00 : f32
    %37 = vector.broadcast %cst_25 : f32 to vector<8x128xf32>
    %38 = arith.select %29, %36, %37 : vector<8x128xi1>, vector<8x128xf32>
    %cst_26 = arith.constant dense<0.000000e+00> : vector<8xf32>
    %39 = vector.multi_reduction <add>, %38, %cst_26 [1] : vector<8x128xf32> to vector<8xf32>
    %40 = vector.shape_cast %39 : vector<8xf32> to vector<8x1xf32>
    %41 = tpu.reciprocal %40 {approx = true} : vector<8x1xf32> -> vector<8x1xf32>
    %42 = arith.mulf %40, %41 : vector<8x1xf32>
    %cst_27 = arith.constant 2.000000e+00 : f32
    %43 = vector.broadcast %cst_27 : f32 to vector<8x1xf32>
    %44 = arith.subf %43, %42 : vector<8x1xf32>
    %45 = arith.mulf %41, %44 : vector<8x1xf32>
    %46 = vector.broadcast %45 : vector<8x1xf32> to vector<8x128xf32>
    %47 = arith.mulf %38, %46 : vector<8x128xf32>
    %c0_28 = arith.constant 0 : index
    %c0_29 = arith.constant 0 : index
    %48 = vector.load %arg10[%c0_28, %c0_29] : memref<8x384xf32, #tpu.memory_space<vmem>>, vector<8x256xf32>
    tpu.vector_store %arg10[%c0_28, %c0_29], %14 {strides = array<i32>} : memref<8x384xf32, #tpu.memory_space<vmem>>, vector<8x256xf32>,
    %49 = arith.select %29, %47, %26 : vector<8x128xi1>, vector<8x128xf32>
    %c0_30 = arith.constant 0 : index
    %c256 = arith.constant 256 : index
    %50 = vector.load %arg10[%c0_30, %c256] : memref<8x384xf32, #tpu.memory_space<vmem>>, vector<8x128xf32>
    tpu.vector_store %arg10[%c0_30, %c256], %49 {strides = array<i32>} : memref<8x384xf32, #tpu.memory_space<vmem>>, vector<8x128xf32>,
    return
  }
  func.func @transform_0(%arg0: i32) -> (i32, i32) {
    %c0_i32 = arith.constant 0 : i32
    %c0_i32_0 = arith.constant 0 : i32
    return %arg0, %c0_i32 : i32, i32
  }
  func.func @transform_1(%arg0: i32) -> (i32, i32) {
    %c0_i32 = arith.constant 0 : i32
    %c0_i32_0 = arith.constant 0 : i32
    %c0_i32_1 = arith.constant 0 : i32
    return %c0_i32, %c0_i32_0 : i32, i32
  }
  func.func @transform_2(%arg0: i32) -> (i32, i32) {
    %c0_i32 = arith.constant 0 : i32
    %c0_i32_0 = arith.constant 0 : i32
    %c0_i32_1 = arith.constant 0 : i32
    return %c0_i32, %c0_i32_0 : i32, i32
  }
  func.func @transform_3(%arg0: i32) -> (i32, i32) {
    %c0_i32 = arith.constant 0 : i32
    %c0_i32_0 = arith.constant 0 : i32
    %c0_i32_1 = arith.constant 0 : i32
    return %c0_i32, %c0_i32_0 : i32, i32
  }
  func.func @transform_4(%arg0: i32) -> (i32, i32) {
    %c0_i32 = arith.constant 0 : i32
    %c0_i32_0 = arith.constant 0 : i32
    %c0_i32_1 = arith.constant 0 : i32
    return %c0_i32, %c0_i32_0 : i32, i32
  }
  func.func @transform_5(%arg0: i32) -> (i32, i32) {
    %c0_i32 = arith.constant 0 : i32
    %c0_i32_0 = arith.constant 0 : i32
    %c0_i32_1 = arith.constant 0 : i32
    return %c0_i32, %c0_i32_0 : i32, i32
  }
  func.func @transform_6(%arg0: i32) -> (i32, i32) {
    %c0_i32 = arith.constant 0 : i32
    %c0_i32_0 = arith.constant 0 : i32
    %c0_i32_1 = arith.constant 0 : i32
    return %c0_i32, %c0_i32_0 : i32, i32
  }
  func.func @transform_7(%arg0: i32) -> (i32, i32) {
    %c0_i32 = arith.constant 0 : i32
    %c0_i32_0 = arith.constant 0 : i32
    %c0_i32_1 = arith.constant 0 : i32
    return %c0_i32, %c0_i32_0 : i32, i32
  }
  func.func @transform_8(%arg0: i32) -> (i32, i32) {
    %c0_i32 = arith.constant 0 : i32
    %c0_i32_0 = arith.constant 0 : i32
    %c0_i32_1 = arith.constant 0 : i32
    return %c0_i32, %c0_i32_0 : i32, i32
  }
  func.func @transform_9(%arg0: i32) -> (i32, i32) {
    %c0_i32 = arith.constant 0 : i32
    %c0_i32_0 = arith.constant 0 : i32
    return %arg0, %c0_i32 : i32, i32
  }
}

</mosaic_0001>

<bundles_post_ra>
// kernel: tpu_custom_call.1
= control target key start
LH: loop header
LB: loop body
LE: loop exit
PB: predicated region body
PF: predicated region fallthrough
CT: control target
= control target key end

     0   :  { %14 = vsyncpa [#allocation3], 0  ;;  %s1274_s0 = inlined_call_operand.hbm [shape: f32[8,32], index: 0, kind: input, shape index: {}]   ;;  %s1275_s1 = inlined_call_operand.hbm [shape: f32[32,256], index: 1, kind: input, shape index: {}]   ;;  %s1276_s2 = inlined_call_operand.vmem [shape: f32[1,256], index: 2, kind: input, shape index: {}]   ;;  %s1277_s3 = inlined_call_operand.hbm [shape: f32[256,256], index: 3, kind: input, shape index: {}]   ;;  %s1278_s4 = inlined_call_operand.hbm [shape: f32[1,256], index: 4, kind: input, shape index: {}]   ;;  %s1279_s5 = inlined_call_operand.hbm [shape: f32[256,512], index: 5, kind: input, shape index: {}]   ;;  %s1280_s6 = inlined_call_operand.vmem [shape: f32[1,512], index: 6, kind: input, shape index: {}]   ;;  %s1281_s7 = inlined_call_operand.hbm [shape: f32[512,128], index: 7, kind: input, shape index: {}]   ;;  %s1282_s8 = inlined_call_operand.vmem [shape: f32[1,128], index: 8, kind: input, shape index: {}]   ;;  %s1283_s9 = inlined_call_operand.hbm [shape: f32[8,384], index: 9, kind: output, shape index: {}]  }
   0x1   :  { %15 = vsyncpa [#allocation6], 0 }
   0x2   :  { %16 = vsyncpa [#allocation9], 0 }
   0x3   :  { %17 = vsyncpa [#allocation12], 0 }
   0x4   :  { %18 = vsyncpa [#allocation4], 0  ;;  %s1144_s30 = smov [#allocation5]  }
   0x5   :  { %s34_s10 = sshll.u32 %s1144_s30, 4  ;;  %s35_s10 = int_to_ptr.vmem [resolvable:$true] %s34_s10 }
   0x6   :  { %s1002_s11 = scalar_lea.vmem %s35_s10, 1024  ;;  %p1007_p1 = scmp.lt.s32.totalorder %s35_s10, %s35_s10 }
   0x7   :  { %p1003_p0 = scmp.ne.s32.totalorder %s35_s10, %s1002_s11  ;;  %p1008_p2 = scmp.lt.s32.totalorder %s1002_s11, %s1002_s11 }
   0x9   :  { %p1009_p3 = por %p1008_p2, %p1007_p1 }
   0xb   :  { %p1010_p4 = pnand %p1009_p3, %p1003_p0 }
   0xd   :  { %1013 = shalt.err (!%p1010_p4)
}
   0xe   :  { %s1145_s12 = smov 256   ;;  %s1146_s13 = smov 16  }
   0xf   :  { %40 = dma.hbm_to_vmem [thread:$0]  %s1275_s1, 1024, %s35_s10, [#allocation6], %s1145_s12, %s1145_s12, %s1146_s13  }
  0x10   :  { %s1147_s16 = smov [#allocation8]   ;;  %s1148_s18 = smov [#allocation2]  }
  0x11   :  { %s61_s17 = sshll.u32 %s1147_s16, 4  ;;  %s25_s19 = sshll.u32 %s1148_s18, 4  ;;  %s62_s17 = int_to_ptr.vmem [resolvable:$true] %s61_s17  ;;  %s26_s19 = int_to_ptr.vmem [resolvable:$true] %s25_s19 }
  0x12   :  { %s1022_s20 = scalar_lea.vmem %s62_s17, 32  ;;  %p1027_p6 = scmp.lt.s32.totalorder %s62_s17, %s62_s17 }
  0x13   :  { %p1023_p5 = scmp.ne.s32.totalorder %s62_s17, %s1022_s20  ;;  %p1028_p7 = scmp.lt.s32.totalorder %s1022_s20, %s1022_s20 }
  0x15   :  { %p1029_p8 = por %p1028_p7, %p1027_p6 }
  0x17   :  { %p1030_p9 = pnand %p1029_p8, %p1023_p5 }
  0x19   :  { %1033 = shalt.err (!%p1030_p9)
}
  0x1a   :  { %64 = dma.hbm_to_vmem [thread:$0]  %s1278_s4, 32, %s62_s17, [#allocation9]  }
  0x1b   :  { %s1042_s23 = scalar_lea.vmem %s26_s19, 128  ;;  %p1047_p11 = scmp.lt.s32.totalorder %s26_s19, %s26_s19 }
  0x1c   :  { %p1043_p10 = scmp.ne.s32.totalorder %s26_s19, %s1042_s23  ;;  %p1048_p12 = scmp.lt.s32.totalorder %s1042_s23, %s1042_s23 }
  0x1e   :  { %p1049_p13 = por %p1048_p12, %p1047_p11 }
  0x20   :  { %p1050_p0 = pnand %p1049_p13, %p1043_p10 }
  0x22   :  { %1053 = shalt.err (!%p1050_p0)
}
  0x23   :  { %28 = dma.hbm_to_vmem [thread:$0]  %s1274_s0, 128, %s26_s19, [#allocation3]  }
  0x24   :  { %s1149_s25 = smov [#allocation7]   ;;  %s1150_s27 = smov [#allocation10]  }
  0x25   :  { %s48_s26 = sshll.u32 %s1149_s25, 4  ;;  %s70_s28 = sshll.u32 %s1150_s27, 4  ;;  %s49_s26 = int_to_ptr.vmem [resolvable:$true] %s48_s26  ;;  %s71_s28 = int_to_ptr.vmem [resolvable:$true] %s70_s28 }
  0x26   :  { %s1062_s29 = scalar_lea.vmem %s49_s26, 8192  ;;  %p1067_p2 = scmp.lt.s32.totalorder %s49_s26, %s49_s26 }
  0x27   :  { %p1063_p1 = scmp.ne.s32.totalorder %s49_s26, %s1062_s29  ;;  %p1068_p3 = scmp.lt.s32.totalorder %s1062_s29, %s1062_s29 }
  0x29   :  { %p1069_p4 = por %p1068_p3, %p1067_p2 }
  0x2b   :  { %p1070_p5 = pnand %p1069_p4, %p1063_p1 }
  0x2d   :  { %1073 = shalt.err (!%p1070_p5)
}
  0x2e   :  { %54 = dma.hbm_to_vmem [thread:$0]  %s1277_s3, 8192, %s49_s26, [#allocation6], %s1145_s12, %s1145_s12, %s1146_s13  }
  0x2f   :  { %s1082_s0 = scalar_lea.vmem %s71_s28, 16384  ;;  %p1087_p7 = scmp.lt.s32.totalorder %s71_s28, %s71_s28 }
  0x30   :  { %p1083_p6 = scmp.ne.s32.totalorder %s71_s28, %s1082_s0  ;;  %p1088_p8 = scmp.lt.s32.totalorder %s1082_s0, %s1082_s0 }
  0x32   :  { %p1089_p9 = por %p1088_p8, %p1087_p7 }
  0x34   :  { %p1090_p10 = pnand %p1089_p9, %p1083_p6 }
  0x36   :  { %1093 = shalt.err (!%p1090_p10)
}
  0x37   :  { %s1151_s10 = smov 512   ;;  %s1152_s11 = smov 32  }
  0x38   :  { %76 = dma.hbm_to_vmem [thread:$0]  %s1279_s5, 16384, %s71_s28, [#allocation9], %s1151_s10, %s1151_s10, %s1152_s11  }
  0x39   :  { %s1153_s16 = smov [#allocation11]  }
  0x3a   :  { %s84_s17 = sshll.u32 %s1153_s16, 4  ;;  %s85_s17 = int_to_ptr.vmem [resolvable:$true] %s84_s17 }
  0x3b   :  { %s1102_s18 = scalar_lea.vmem %s85_s17, 8192  ;;  %p1107_p12 = scmp.lt.s32.totalorder %s85_s17, %s85_s17 }
  0x3c   :  { %p1103_p11 = scmp.ne.s32.totalorder %s85_s17, %s1102_s18  ;;  %p1108_p13 = scmp.lt.s32.totalorder %s1102_s18, %s1102_s18 }
  0x3e   :  { %p1109_p0 = por %p1108_p13, %p1107_p12 }
  0x40   :  { %p1110_p1 = pnand %p1109_p0, %p1103_p11 }
  0x42   :  { %1113 = shalt.err (!%p1110_p1)
}
  0x43   :  { %s1154_s3 = smov 128   ;;  %s1155_s12 = smov 8  }
  0x44   :  { %90 = dma.hbm_to_vmem [thread:$0]  %s1281_s7, 8192, %s85_s17, [#allocation12], %s1154_s3, %s1154_s3, %s1155_s12  }
  0x45   :  { %1134 = dma.done.wait [#allocation3], 128  }
  0x46   :  { %1135 = vsyncadd [#allocation3], 4294967168 }
  0x47   :  { %1136 = dma.done.wait [#allocation6], 9216  }
  0x48   :  { %1137 = vsyncadd [#allocation6], 4294958080 }
  0x49   :  { %1138 = dma.done.wait [#allocation9], 16416  }
  0x4a   :  { %1139 = vsyncadd [#allocation9], 4294950880 }
  0x4b   :  { %1140 = dma.done.wait [#allocation12], 8192  }
  0x4c   :  { %1141 = vsyncadd [#allocation12], 4294959104  ;;  %v1156_v0 = vmov 0.0   ;;  %v119_v1 = vld [vmem:[#allocation5 + $0x38] sm:$0xff]  ;;  %v118_v2 = vld [vmem:[#allocation5 + $0x30] sm:$0xff]  ;;  %vm132_vm0 = vcmask 261120  }
  0x4d   :  { %200 = vmatprep.mubr.f32.mxu0 %v1156_v0  ;;  %v117_v3 = vld [vmem:[#allocation5 + $0x28] sm:$0xff]  ;;  %160 = vmatprep.subr.mxu0 %v119_v1  ;;  %v116_v4 = vld [vmem:[#allocation5 + $0x20] sm:$0xff]  ;;  %v115_v5 = vld [vmem:[#allocation5 + $0x18] sm:$0xff] }
  0x4e   :  { %161 = vmatpush1.msra.mxu0 %v118_v2  ;;  %v114_v6 = vld [vmem:[#allocation5 + $0x10] sm:$0xff]  ;;  %v240_v7 = vld [vmem:[#allocation7 + $0xf8] sm:$0xff]  ;;  %v238_v9 = vld [vmem:[#allocation7 + $0xe8] sm:$0xff] }
  0x4f   :  { %162 = vmatprep.subr.mxu0 %v117_v3  ;;  %v239_v8 = vld [vmem:[#allocation7 + $0xf0] sm:$0xff]  ;;  %v113_v10 = vld [vmem:[#allocation5 + $0x8] sm:$0xff]  ;;  %285 = vmatprep.subr.mxu1 %v240_v7  ;;  %v237_v11 = vld [vmem:[#allocation7 + $0xe0] sm:$0xff] }
  0x50   :  { %163 = vmatpush1.msra.mxu0 %v116_v4  ;;  %v112_v12 = vld [vmem:[#allocation5] sm:$0xff]  ;;  %286 = vmatpush1.msra.mxu1 %v239_v8  ;;  %v236_v13 = vld [vmem:[#allocation7 + $0xd8] sm:$0xff]  ;;  %v235_v15 = vld [vmem:[#allocation7 + $0xd0] sm:$0xff] }
  0x51   :  { %164 = vmatprep.subr.mxu0 %v115_v5  ;;  %v111_v14 = vld [vmem:[#allocation2] sm:$0xff]  ;;  %287 = vmatprep.subr.mxu1 %v238_v9  ;;  %v234_v16 = vld [vmem:[#allocation7 + $0xc8] sm:$0xff]  ;;  %v233_v17 = vld [vmem:[#allocation7 + $0xc0] sm:$0xff] }
  0x52   :  { %165 = vmatpush1.msra.mxu0 %v114_v6  ;;  %288 = vmatpush1.msra.mxu1 %v237_v11  ;;  %v232_v18 = vld [vmem:[#allocation7 + $0xb8] sm:$0xff]  ;;  %v231_v19 = vld [vmem:[#allocation7 + $0xb0] sm:$0xff]  ;;  %v230_v20 = vld [vmem:[#allocation7 + $0xa8] sm:$0xff] }
  0x53   :  { %166 = vmatprep.subr.mxu0 %v113_v10  ;;  %289 = vmatprep.subr.mxu1 %v236_v13  ;;  %v229_v21 = vld [vmem:[#allocation7 + $0xa0] sm:$0xff]  ;;  %v228_v22 = vld [vmem:[#allocation7 + $0x98] sm:$0xff]  ;;  %v227_v23 = vld [vmem:[#allocation7 + $0x90] sm:$0xff] }
  0x54   :  { %167 = vmatpush1.msra.mxu0 %v112_v12  ;;  %290 = vmatpush1.msra.mxu1 %v235_v15  ;;  %v226_v24 = vld [vmem:[#allocation7 + $0x88] sm:$0xff]  ;;  %v225_v25 = vld [vmem:[#allocation7 + $0x80] sm:$0xff]  ;;  %v224_v26 = vld [vmem:[#allocation7 + $0x78] sm:$0xff] }
  0x55   :  { %904 = vmatmul.mubr.msk.f32.vlgmr.msra.gmra.mxu0 %vm132_vm0, %v111_v14  ;;  %291 = vmatprep.subr.mxu1 %v234_v16  ;;  %v223_v27 = vld [vmem:[#allocation7 + $0x70] sm:$0xff]  ;;  %v222_v28 = vld [vmem:[#allocation7 + $0x68] sm:$0xff]  ;;  %v221_v29 = vld [vmem:[#allocation7 + $0x60] sm:$0xff] }
  0x56   :  { %292 = vmatpush1.msra.mxu1 %v233_v17  ;;  %v220_v30 = vld [vmem:[#allocation7 + $0x58] sm:$0xff]  ;;  %v219_v31 = vld [vmem:[#allocation7 + $0x50] sm:$0xff]  ;;  %v218_v32 = vld [vmem:[#allocation7 + $0x48] sm:$0xff] }
  0x57   :  { %293 = vmatprep.subr.mxu1 %v232_v18  ;;  %v217_v33 = vld [vmem:[#allocation7 + $0x40] sm:$0xff]  ;;  %v216_v34 = vld [vmem:[#allocation7 + $0x38] sm:$0xff]  ;;  %v215_v35 = vld [vmem:[#allocation7 + $0x30] sm:$0xff] }
  0x58   :  { %294 = vmatpush1.msra.mxu1 %v231_v19  ;;  %v214_v36 = vld [vmem:[#allocation7 + $0x28] sm:$0xff]  ;;  %v213_v37 = vld [vmem:[#allocation7 + $0x20] sm:$0xff]  ;;  %v212_v38 = vld [vmem:[#allocation7 + $0x18] sm:$0xff] }
  0x59   :  { %295 = vmatprep.subr.mxu1 %v230_v20  ;;  %v211_v39 = vld [vmem:[#allocation7 + $0x10] sm:$0xff]  ;;  %v210_v40 = vld [vmem:[#allocation7 + $0x8] sm:$0xff]  ;;  %v209_v41 = vld [vmem:[#allocation7] sm:$0xff] }
  0x5a   :  { %296 = vmatpush1.msra.mxu1 %v229_v21  ;;  %v272_v42 = vld [vmem:[#allocation7 + $0x1f8] sm:$0xff]  ;;  %v271_v43 = vld [vmem:[#allocation7 + $0x1f0] sm:$0xff]  ;;  %v270_v44 = vld [vmem:[#allocation7 + $0x1e8] sm:$0xff] }
  0x5b   :  { %297 = vmatprep.subr.mxu1 %v228_v22  ;;  %v269_v45 = vld [vmem:[#allocation7 + $0x1e0] sm:$0xff]  ;;  %v268_v46 = vld [vmem:[#allocation7 + $0x1d8] sm:$0xff]  ;;  %v267_v47 = vld [vmem:[#allocation7 + $0x1d0] sm:$0xff] }
  0x5c   :  { %298 = vmatpush1.msra.mxu1 %v227_v23  ;;  %v266_v48 = vld [vmem:[#allocation7 + $0x1c8] sm:$0xff]  ;;  %v265_v49 = vld [vmem:[#allocation7 + $0x1c0] sm:$0xff]  ;;  %v264_v50 = vld [vmem:[#allocation7 + $0x1b8] sm:$0xff] }
  0x5d   :  { %299 = vmatprep.subr.mxu1 %v226_v24  ;;  %v263_v51 = vld [vmem:[#allocation7 + $0x1b0] sm:$0xff]  ;;  %v262_v52 = vld [vmem:[#allocation7 + $0x1a8] sm:$0xff]  ;;  %v261_v53 = vld [vmem:[#allocation7 + $0x1a0] sm:$0xff] }
  0x5e   :  { %300 = vmatpush1.msra.mxu1 %v225_v25  ;;  %v260_v54 = vld [vmem:[#allocation7 + $0x198] sm:$0xff]  ;;  %v259_v55 = vld [vmem:[#allocation7 + $0x190] sm:$0xff]  ;;  %v258_v56 = vld [vmem:[#allocation7 + $0x188] sm:$0xff] }
  0x5f   :  { %301 = vmatprep.subr.mxu1 %v224_v26  ;;  %v257_v57 = vld [vmem:[#allocation7 + $0x180] sm:$0xff]  ;;  %v256_v58 = vld [vmem:[#allocation7 + $0x178] sm:$0xff]  ;;  %v255_v59 = vld [vmem:[#allocation7 + $0x170] sm:$0xff] }
  0x60   :  { %302 = vmatpush1.msra.mxu1 %v223_v27  ;;  %v254_v60 = vld [vmem:[#allocation7 + $0x168] sm:$0xff]  ;;  %v253_v61 = vld [vmem:[#allocation7 + $0x160] sm:$0xff]  ;;  %v252_v62 = vld [vmem:[#allocation7 + $0x158] sm:$0xff] }
  0x61   :  { %303 = vmatprep.subr.mxu1 %v222_v28  ;;  %v251_v63 = vld [vmem:[#allocation7 + $0x150] sm:$0xff]  ;;  %v250_v0 = vld [vmem:[#allocation7 + $0x148] sm:$0xff]  ;;  %v249_v1 = vld [vmem:[#allocation7 + $0x140] sm:$0xff] }
  0x62   :  { %304 = vmatpush1.msra.mxu1 %v221_v29  ;;  %v248_v2 = vld [vmem:[#allocation7 + $0x138] sm:$0xff]  ;;  %v247_v3 = vld [vmem:[#allocation7 + $0x130] sm:$0xff]  ;;  %v246_v4 = vld [vmem:[#allocation7 + $0x128] sm:$0xff] }
  0x63   :  { %305 = vmatprep.subr.mxu1 %v220_v30  ;;  %v245_v5 = vld [vmem:[#allocation7 + $0x120] sm:$0xff]  ;;  %v244_v6 = vld [vmem:[#allocation7 + $0x118] sm:$0xff]  ;;  %v243_v7 = vld [vmem:[#allocation7 + $0x110] sm:$0xff] }
  0x64   :  { %306 = vmatpush1.msra.mxu1 %v219_v31  ;;  %v242_v8 = vld [vmem:[#allocation7 + $0x108] sm:$0xff]  ;;  %v241_v9 = vld [vmem:[#allocation7 + $0x100] sm:$0xff] }
  0x65   :  { %307 = vmatprep.subr.mxu1 %v218_v32  ;;  %v419_v10 = vld [vmem:[#allocation10 + $0x1e8] sm:$0xff]  ;;  %v421_v11 = vld [vmem:[#allocation10 + $0x1f8] sm:$0xff]  ;;  %v418_v12 = vld [vmem:[#allocation10 + $0x1e0] sm:$0xff] }
  0x66   :  { %308 = vmatpush1.msra.mxu1 %v217_v33  ;;  %508 = vmatprep.subr.mxu0 %v419_v10  ;;  %v415_v13 = vld [vmem:[#allocation10 + $0x1c8] sm:$0xff]  ;;  %v414_v14 = vld [vmem:[#allocation10 + $0x1c0] sm:$0xff] }
  0x67   :  { %309 = vmatprep.subr.mxu1 %v216_v34  ;;  %509 = vmatpush1.msra.mxu0 %v418_v12  ;;  %v411_v15 = vld [vmem:[#allocation10 + $0x1a8] sm:$0xff]  ;;  %v410_v16 = vld [vmem:[#allocation10 + $0x1a0] sm:$0xff] }
  0x68   :  { %310 = vmatpush1.msra.mxu1 %v215_v35  ;;  %510 = vmatprep.subr.mxu0 %v415_v13  ;;  %v407_v17 = vld [vmem:[#allocation10 + $0x188] sm:$0xff]  ;;  %v406_v18 = vld [vmem:[#allocation10 + $0x180] sm:$0xff] }
  0x69   :  { %311 = vmatprep.subr.mxu1 %v214_v36  ;;  %511 = vmatpush1.msra.mxu0 %v414_v14  ;;  %v403_v19 = vld [vmem:[#allocation10 + $0x168] sm:$0xff]  ;;  %v402_v20 = vld [vmem:[#allocation10 + $0x160] sm:$0xff] }
  0x6a   :  { %312 = vmatpush1.msra.mxu1 %v213_v37  ;;  %512 = vmatprep.subr.mxu0 %v411_v15  ;;  %v399_v21 = vld [vmem:[#allocation10 + $0x148] sm:$0xff]  ;;  %v398_v22 = vld [vmem:[#allocation10 + $0x140] sm:$0xff] }
  0x6b   :  { %313 = vmatprep.subr.mxu1 %v212_v38  ;;  %513 = vmatpush1.msra.mxu0 %v410_v16  ;;  %v395_v23 = vld [vmem:[#allocation10 + $0x128] sm:$0xff]  ;;  %v394_v24 = vld [vmem:[#allocation10 + $0x120] sm:$0xff]  ;;  %v420_v16 = vld [vmem:[#allocation10 + $0x1f0] sm:$0xff] }
  0x6c   :  { %314 = vmatpush1.msra.mxu1 %v211_v39  ;;  %514 = vmatprep.subr.mxu0 %v407_v17  ;;  %v391_v25 = vld [vmem:[#allocation10 + $0x108] sm:$0xff]  ;;  %v390_v26 = vld [vmem:[#allocation10 + $0x100] sm:$0xff]  ;;  %v417_v17 = vld [vmem:[#allocation10 + $0x1d8] sm:$0xff] }
  0x6d   :  { %315 = vmatprep.subr.mxu1 %v210_v40  ;;  %515 = vmatpush1.msra.mxu0 %v406_v18  ;;  %v387_v27 = vld [vmem:[#allocation10 + $0xe8] sm:$0xff]  ;;  %v386_v28 = vld [vmem:[#allocation10 + $0xe0] sm:$0xff]  ;;  %v416_v18 = vld [vmem:[#allocation10 + $0x1d0] sm:$0xff] }
  0x6e   :  { %316 = vmatpush1.msra.mxu1 %v209_v41  ;;  %516 = vmatprep.subr.mxu0 %v403_v19  ;;  %v383_v29 = vld [vmem:[#allocation10 + $0xc8] sm:$0xff]  ;;  %v382_v30 = vld [vmem:[#allocation10 + $0xc0] sm:$0xff]  ;;  %v413_v19 = vld [vmem:[#allocation10 + $0x1b8] sm:$0xff] }
  0x6f   :  { %317 = vmatprep.subr.mxu1 %v272_v42  ;;  %517 = vmatpush1.msra.mxu0 %v402_v20  ;;  %v379_v31 = vld [vmem:[#allocation10 + $0xa8] sm:$0xff]  ;;  %v378_v32 = vld [vmem:[#allocation10 + $0xa0] sm:$0xff]  ;;  %v412_v20 = vld [vmem:[#allocation10 + $0x1b0] sm:$0xff] }
  0x70   :  { %318 = vmatpush2.msra.mxu1 %v271_v43  ;;  %518 = vmatprep.subr.mxu0 %v399_v21  ;;  %v375_v33 = vld [vmem:[#allocation10 + $0x88] sm:$0xff]  ;;  %v374_v34 = vld [vmem:[#allocation10 + $0x80] sm:$0xff]  ;;  %v409_v21 = vld [vmem:[#allocation10 + $0x198] sm:$0xff] }
  0x71   :  { %319 = vmatprep.subr.mxu1 %v270_v44  ;;  %519 = vmatpush1.msra.mxu0 %v398_v22  ;;  %v371_v35 = vld [vmem:[#allocation10 + $0x68] sm:$0xff]  ;;  %v370_v36 = vld [vmem:[#allocation10 + $0x60] sm:$0xff]  ;;  %v408_v22 = vld [vmem:[#allocation10 + $0x190] sm:$0xff] }
  0x72   :  { %320 = vmatpush2.msra.mxu1 %v269_v45  ;;  %520 = vmatprep.subr.mxu0 %v395_v23  ;;  %v367_v37 = vld [vmem:[#allocation10 + $0x48] sm:$0xff]  ;;  %v366_v38 = vld [vmem:[#allocation10 + $0x40] sm:$0xff]  ;;  %v405_v23 = vld [vmem:[#allocation10 + $0x178] sm:$0xff] }
  0x73   :  { %321 = vmatprep.subr.mxu1 %v268_v46  ;;  %521 = vmatpush1.msra.mxu0 %v394_v24  ;;  %v363_v39 = vld [vmem:[#allocation10 + $0x28] sm:$0xff]  ;;  %v362_v40 = vld [vmem:[#allocation10 + $0x20] sm:$0xff]  ;;  %v404_v24 = vld [vmem:[#allocation10 + $0x170] sm:$0xff] }
  0x74   :  { %322 = vmatpush2.msra.mxu1 %v267_v47  ;;  %522 = vmatprep.subr.mxu0 %v391_v25  ;;  %v359_v41 = vld [vmem:[#allocation10 + $0x8] sm:$0xff]  ;;  %v358_v42 = vld [vmem:[#allocation10] sm:$0xff]  ;;  %v401_v25 = vld [vmem:[#allocation10 + $0x158] sm:$0xff] }
  0x75   :  { %323 = vmatprep.subr.mxu1 %v266_v48  ;;  %523 = vmatpush1.msra.mxu0 %v390_v26  ;;  %v483_v43 = vld [vmem:[#allocation10 + $0x3e8] sm:$0xff]  ;;  %v482_v44 = vld [vmem:[#allocation10 + $0x3e0] sm:$0xff]  ;;  %v400_v26 = vld [vmem:[#allocation10 + $0x150] sm:$0xff] }
  0x76   :  { %324 = vmatpush2.msra.mxu1 %v265_v49  ;;  %524 = vmatprep.subr.mxu0 %v387_v27  ;;  %v479_v45 = vld [vmem:[#allocation10 + $0x3c8] sm:$0xff]  ;;  %v478_v46 = vld [vmem:[#allocation10 + $0x3c0] sm:$0xff]  ;;  %v397_v27 = vld [vmem:[#allocation10 + $0x138] sm:$0xff] }
  0x77   :  { %325 = vmatprep.subr.mxu1 %v264_v50  ;;  %525 = vmatpush1.msra.mxu0 %v386_v28  ;;  %v475_v47 = vld [vmem:[#allocation10 + $0x3a8] sm:$0xff]  ;;  %v474_v48 = vld [vmem:[#allocation10 + $0x3a0] sm:$0xff]  ;;  %v396_v28 = vld [vmem:[#allocation10 + $0x130] sm:$0xff] }
  0x78   :  { %326 = vmatpush2.msra.mxu1 %v263_v51  ;;  %526 = vmatprep.subr.mxu0 %v383_v29  ;;  %v471_v49 = vld [vmem:[#allocation10 + $0x388] sm:$0xff]  ;;  %v470_v50 = vld [vmem:[#allocation10 + $0x380] sm:$0xff]  ;;  %v393_v29 = vld [vmem:[#allocation10 + $0x118] sm:$0xff] }
  0x79   :  { %327 = vmatprep.subr.mxu1 %v262_v52  ;;  %527 = vmatpush1.msra.mxu0 %v382_v30  ;;  %v467_v51 = vld [vmem:[#allocation10 + $0x368] sm:$0xff]  ;;  %v466_v52 = vld [vmem:[#allocation10 + $0x360] sm:$0xff]  ;;  %v392_v30 = vld [vmem:[#allocation10 + $0x110] sm:$0xff] }
  0x7a   :  { %328 = vmatpush2.msra.mxu1 %v261_v53  ;;  %528 = vmatprep.subr.mxu0 %v379_v31  ;;  %v463_v53 = vld [vmem:[#allocation10 + $0x348] sm:$0xff]  ;;  %v389_v31 = vld [vmem:[#allocation10 + $0xf8] sm:$0xff] }
  0x7b   :  { %329 = vmatprep.subr.mxu1 %v260_v54  ;;  %529 = vmatpush1.msra.mxu0 %v378_v32  ;;  %v462_v54 = vld [vmem:[#allocation10 + $0x340] sm:$0xff]  ;;  %v388_v32 = vld [vmem:[#allocation10 + $0xf0] sm:$0xff] }
  0x7c   :  { %330 = vmatpush2.msra.mxu1 %v259_v55  ;;  %530 = vmatprep.subr.mxu0 %v375_v33  ;;  %v459_v55 = vld [vmem:[#allocation10 + $0x328] sm:$0xff]  ;;  %v385_v33 = vld [vmem:[#allocation10 + $0xd8] sm:$0xff] }
  0x7d   :  { %331 = vmatprep.subr.mxu1 %v258_v56  ;;  %531 = vmatpush1.msra.mxu0 %v374_v34  ;;  %v458_v56 = vld [vmem:[#allocation10 + $0x320] sm:$0xff]  ;;  %v384_v34 = vld [vmem:[#allocation10 + $0xd0] sm:$0xff] }
  0x7e   :  { %332 = vmatpush2.msra.mxu1 %v257_v57  ;;  %532 = vmatprep.subr.mxu0 %v371_v35  ;;  %v455_v57 = vld [vmem:[#allocation10 + $0x308] sm:$0xff]  ;;  %v381_v35 = vld [vmem:[#allocation10 + $0xb8] sm:$0xff] }
  0x7f   :  { %333 = vmatprep.subr.mxu1 %v256_v58  ;;  %533 = vmatpush1.msra.mxu0 %v370_v36  ;;  %v454_v58 = vld [vmem:[#allocation10 + $0x300] sm:$0xff]  ;;  %v380_v36 = vld [vmem:[#allocation10 + $0xb0] sm:$0xff] }
  0x80   :  { %334 = vmatpush2.msra.mxu1 %v255_v59  ;;  %534 = vmatprep.subr.mxu0 %v367_v37  ;;  %v451_v59 = vld [vmem:[#allocation10 + $0x2e8] sm:$0xff]  ;;  %v377_v37 = vld [vmem:[#allocation10 + $0x98] sm:$0xff] }
  0x81   :  { %335 = vmatprep.subr.mxu1 %v254_v60  ;;  %535 = vmatpush1.msra.mxu0 %v366_v38  ;;  %v450_v60 = vld [vmem:[#allocation10 + $0x2e0] sm:$0xff]  ;;  %v376_v38 = vld [vmem:[#allocation10 + $0x90] sm:$0xff] }
  0x82   :  { %336 = vmatpush2.msra.mxu1 %v253_v61  ;;  %536 = vmatprep.subr.mxu0 %v363_v39  ;;  %v447_v61 = vld [vmem:[#allocation10 + $0x2c8] sm:$0xff]  ;;  %v373_v39 = vld [vmem:[#allocation10 + $0x78] sm:$0xff] }
  0x83   :  { %337 = vmatprep.subr.mxu1 %v252_v62  ;;  %537 = vmatpush1.msra.mxu0 %v362_v40  ;;  %v446_v62 = vld [vmem:[#allocation10 + $0x2c0] sm:$0xff]  ;;  %v372_v40 = vld [vmem:[#allocation10 + $0x70] sm:$0xff] }
  0x84   :  { %338 = vmatpush2.msra.mxu1 %v251_v63  ;;  %538 = vmatprep.subr.mxu0 %v359_v41  ;;  %v443_v63 = vld [vmem:[#allocation10 + $0x2a8] sm:$0xff]  ;;  %v369_v41 = vld [vmem:[#allocation10 + $0x58] sm:$0xff] }
  0x85   :  { %339 = vmatprep.subr.mxu1 %v250_v0  ;;  %539 = vmatpush1.msra.mxu0 %v358_v42  ;;  %v442_v0 = vld [vmem:[#allocation10 + $0x2a0] sm:$0xff]  ;;  %v368_v42 = vld [vmem:[#allocation10 + $0x50] sm:$0xff] }
  0x86   :  { %340 = vmatpush2.msra.mxu1 %v249_v1  ;;  %540 = vmatprep.subr.mxu0 %v483_v43  ;;  %v439_v1 = vld [vmem:[#allocation10 + $0x288] sm:$0xff]  ;;  %v365_v43 = vld [vmem:[#allocation10 + $0x38] sm:$0xff] }
  0x87   :  { %341 = vmatprep.subr.mxu1 %v248_v2  ;;  %541 = vmatpush2.msra.mxu0 %v482_v44  ;;  %v438_v2 = vld [vmem:[#allocation10 + $0x280] sm:$0xff]  ;;  %v364_v44 = vld [vmem:[#allocation10 + $0x30] sm:$0xff] }
  0x88   :  { %342 = vmatpush2.msra.mxu1 %v247_v3  ;;  %542 = vmatprep.subr.mxu0 %v479_v45  ;;  %v122_v3 = vlaneseq  ;;  %v361_v45 = vld [vmem:[#allocation10 + $0x18] sm:$0xff] }
  0x89   :  { %343 = vmatprep.subr.mxu1 %v246_v4  ;;  %543 = vmatpush2.msra.mxu0 %v478_v46  ;;  %v360_v46 = vld [vmem:[#allocation10 + $0x10] sm:$0xff] }
  0x8a   :  { %344 = vmatpush2.msra.mxu1 %v245_v5  ;;  %544 = vmatprep.subr.mxu0 %v475_v47  ;;  %v1233_v4 = vshrl.u32 %v122_v3, 7  ;;  %v485_v47 = vld [vmem:[#allocation10 + $0x3f8] sm:$0xff] }
  0x8b   :  { %345 = vmatprep.subr.mxu1 %v244_v6  ;;  %545 = vmatpush2.msra.mxu0 %v474_v48  ;;  %v120_v6 = vld [vmem:[%s1276_s2] sm:$0x3] }
  0x8c   :  { %346 = vmatpush2.msra.mxu1 %v243_v7  ;;  %546 = vmatprep.subr.mxu0 %v471_v49  ;;  %v1236_v5 = vsub.s32 0, %v1233_v4  ;;  %v1242_v7 = vsub.s32 1, %v1233_v4  ;;  %v484_v48 = vld [vmem:[#allocation10 + $0x3f0] sm:$0xff]  ;;  %v481_v49 = vld [vmem:[#allocation10 + $0x3d8] sm:$0xff] }
  0x8d   :  { %347 = vmatprep.subr.mxu1 %v242_v8  ;;  %547 = vmatpush2.msra.mxu0 %v470_v50  ;;  %v480_v50 = vld [vmem:[#allocation10 + $0x3d0] sm:$0xff] }
  0x8e   :  { %348 = vmatpush2.msra.mxu1 %v241_v9  ;;  %548 = vmatprep.subr.mxu0 %v467_v51  ;;  %v125_v8 = vrot.slane %v120_v6, %v1236_v5  ;;  %v129_v9 = vrot.slane %v120_v6, %v1242_v7  ;;  %v477_v51 = vld [vmem:[#allocation10 + $0x3b8] sm:$0xff] }
  0x8f   :  { %579 = vmatprep.subr.mxu1 %v421_v11  ;;  %549 = vmatpush2.msra.mxu0 %v466_v52  ;;  %v476_v52 = vld [vmem:[#allocation10 + $0x3b0] sm:$0xff]  ;;  %v445_v6 = vld [vmem:[#allocation10 + $0x2b8] sm:$0xff] }
  0x90   :  { %550 = vmatprep.subr.mxu0 %v463_v53  ;;  %v473_v53 = vld [vmem:[#allocation10 + $0x398] sm:$0xff] }
  0x91   :  { %551 = vmatpush2.msra.mxu0 %v462_v54  ;;  %v472_v54 = vld [vmem:[#allocation10 + $0x390] sm:$0xff] }
  0x92   :  { %552 = vmatprep.subr.mxu0 %v459_v55  ;;  %v469_v55 = vld [vmem:[#allocation10 + $0x378] sm:$0xff] }
  0x93   :  { %553 = vmatpush2.msra.mxu0 %v458_v56  ;;  %v468_v56 = vld [vmem:[#allocation10 + $0x370] sm:$0xff] }
  0x94   :  { %554 = vmatprep.subr.mxu0 %v455_v57  ;;  %v465_v57 = vld [vmem:[#allocation10 + $0x358] sm:$0xff] }
  0x95   :  { %555 = vmatpush2.msra.mxu0 %v454_v58  ;;  %v464_v58 = vld [vmem:[#allocation10 + $0x350] sm:$0xff] }
  0x96   :  { %556 = vmatprep.subr.mxu0 %v451_v59  ;;  %v461_v59 = vld [vmem:[#allocation10 + $0x338] sm:$0xff] }
  0x97   :  { %557 = vmatpush2.msra.mxu0 %v450_v60  ;;  %v460_v60 = vld [vmem:[#allocation10 + $0x330] sm:$0xff] }
  0x98   :  { %558 = vmatprep.subr.mxu0 %v447_v61  ;;  %v457_v61 = vld [vmem:[#allocation10 + $0x318] sm:$0xff] }
  0x99   :  { %559 = vmatpush2.msra.mxu0 %v446_v62  ;;  %v456_v62 = vld [vmem:[#allocation10 + $0x310] sm:$0xff] }
  0x9a   :  { %560 = vmatprep.subr.mxu0 %v443_v63  ;;  %v453_v63 = vld [vmem:[#allocation10 + $0x2f8] sm:$0xff] }
  0x9b   :  { %561 = vmatpush2.msra.mxu0 %v442_v0  ;;  %v452_v0 = vld [vmem:[#allocation10 + $0x2f0] sm:$0xff] }
  0x9c   :  { %562 = vmatprep.subr.mxu0 %v439_v1  ;;  %v449_v1 = vld [vmem:[#allocation10 + $0x2d8] sm:$0xff] }
  0x9d   :  { %563 = vmatpush2.msra.mxu0 %v438_v2  ;;  %v448_v2 = vld [vmem:[#allocation10 + $0x2d0] sm:$0xff] }
 0x115   :  { %v202_v10 = vpop.f32.mrf.mxu0 }
 0x116   :  { %v203_v11 = vadd.f32 %v202_v10, %v125_v8  ;;  %v444_v8 = vld [vmem:[#allocation10 + $0x2b0] sm:$0xff] }
 0x117   :  { %v204_v12 = vpop.f32.mrf.mxu0  ;;  %v440_v10 = vld [vmem:[#allocation10 + $0x290] sm:$0xff] }
 0x118   :  { %v205_v13 = vadd.f32 %v204_v12, %v129_v9  ;;  %v207_v15 = vmax.f32 %v203_v11, 0.0  ;;  %v441_v9 = vld [vmem:[#allocation10 + $0x298] sm:$0xff]  ;;  %v435_v11 = vld [vmem:[#allocation10 + $0x268] sm:$0xff] }
 0x119   :  { %v437_v12 = vld [vmem:[#allocation10 + $0x278] sm:$0xff]  ;;  %564 = vmatprep.subr.mxu0 %v435_v11 }
 0x11a   :  { %v208_v14 = vmax.f32 %v205_v13, 0.0  ;;  %v434_v13 = vld [vmem:[#allocation10 + $0x260] sm:$0xff] }
 0x11b   :  { %565 = vmatpush2.msra.mxu0 %v434_v13 }
 0x11c   :  { %349 = vmatprep.mubr.f32.mxu1 %v208_v14  ;;  %v436_v14 = vld [vmem:[#allocation10 + $0x270] sm:$0xff] }
 0x11d   :  { %350 = vmatmul.mubr.f32.vlgmr.msra.gmra.mxu1 %v207_v15  ;;  %v431_v15 = vld [vmem:[#allocation10 + $0x248] sm:$0xff] }
 0x11e   :  { %580 = vmatpush1.msra.mxu1 %v420_v16  ;;  %v433_v16 = vld [vmem:[#allocation10 + $0x258] sm:$0xff]  ;;  %566 = vmatprep.subr.mxu0 %v431_v15 }
 0x11f   :  { %581 = vmatprep.subr.mxu1 %v417_v17  ;;  %v430_v17 = vld [vmem:[#allocation10 + $0x240] sm:$0xff] }
 0x120   :  { %582 = vmatpush1.msra.mxu1 %v416_v18  ;;  %v432_v18 = vld [vmem:[#allocation10 + $0x250] sm:$0xff]  ;;  %567 = vmatpush2.msra.mxu0 %v430_v17 }
 0x121   :  { %583 = vmatprep.subr.mxu1 %v413_v19  ;;  %v427_v19 = vld [vmem:[#allocation10 + $0x228] sm:$0xff] }
 0x122   :  { %584 = vmatpush1.msra.mxu1 %v412_v20  ;;  %v429_v20 = vld [vmem:[#allocation10 + $0x238] sm:$0xff]  ;;  %568 = vmatprep.subr.mxu0 %v427_v19 }
 0x123   :  { %585 = vmatprep.subr.mxu1 %v409_v21  ;;  %v426_v21 = vld [vmem:[#allocation10 + $0x220] sm:$0xff] }
 0x124   :  { %586 = vmatpush1.msra.mxu1 %v408_v22  ;;  %v428_v22 = vld [vmem:[#allocation10 + $0x230] sm:$0xff]  ;;  %569 = vmatpush2.msra.mxu0 %v426_v21 }
 0x125   :  { %587 = vmatprep.subr.mxu1 %v405_v23  ;;  %v423_v23 = vld [vmem:[#allocation10 + $0x208] sm:$0xff] }
 0x126   :  { %588 = vmatpush1.msra.mxu1 %v404_v24  ;;  %v425_v24 = vld [vmem:[#allocation10 + $0x218] sm:$0xff]  ;;  %570 = vmatprep.subr.mxu0 %v423_v23 }
 0x127   :  { %589 = vmatprep.subr.mxu1 %v401_v25  ;;  %v422_v25 = vld [vmem:[#allocation10 + $0x200] sm:$0xff]  ;;  %v701_v23 = vld [vmem:[#allocation11 + $0x178] sm:$0xff] }
 0x128   :  { %590 = vmatpush1.msra.mxu1 %v400_v26  ;;  %v424_v26 = vld [vmem:[#allocation10 + $0x210] sm:$0xff]  ;;  %571 = vmatpush2.msra.mxu0 %v422_v25 }
 0x129   :  { %591 = vmatprep.subr.mxu1 %v397_v27  ;;  %v685_v27 = vld [vmem:[#allocation11 + $0xf8] sm:$0xff]  ;;  %v716_v25 = vld [vmem:[#allocation11 + $0x1f0] sm:$0xff] }
 0x12a   :  { %592 = vmatpush1.msra.mxu1 %v396_v28  ;;  %906 = vmatprep.subr.mxu0 %v685_v27  ;;  %v273_v28 = vld [vmem:[#allocation8] sm:$0x3]  ;;  %v714_v27 = vld [vmem:[#allocation11 + $0x1e0] sm:$0xff] }
 0x12b   :  { %593 = vmatprep.subr.mxu1 %v393_v29  ;;  %v278_v29 = vrot.slane %v273_v28, %v1236_v5 }
 0x12c   :  { %594 = vmatpush1.msra.mxu1 %v392_v30  ;;  %v282_v30 = vrot.slane %v273_v28, %v1242_v7  ;;  %v698_v28 = vld [vmem:[#allocation11 + $0x160] sm:$0xff] }
 0x12d   :  { %595 = vmatprep.subr.mxu1 %v389_v31 }
 0x12e   :  { %596 = vmatpush1.msra.mxu1 %v388_v32 }
 0x12f   :  { %597 = vmatprep.subr.mxu1 %v385_v33 }
 0x130   :  { %598 = vmatpush1.msra.mxu1 %v384_v34 }
 0x131   :  { %599 = vmatprep.subr.mxu1 %v381_v35 }
 0x132   :  { %600 = vmatpush1.msra.mxu1 %v380_v36 }
 0x133   :  { %601 = vmatprep.subr.mxu1 %v377_v37  ;;  %v669_v37 = vld [vmem:[#allocation11 + $0x78] sm:$0xff] }
 0x134   :  { %602 = vmatpush1.msra.mxu1 %v376_v38  ;;  %v684_v38 = vld [vmem:[#allocation11 + $0xf0] sm:$0xff] }
 0x135   :  { %603 = vmatprep.subr.mxu1 %v373_v39  ;;  %v668_v39 = vld [vmem:[#allocation11 + $0x70] sm:$0xff] }
 0x136   :  { %604 = vmatpush1.msra.mxu1 %v372_v40  ;;  %v683_v40 = vld [vmem:[#allocation11 + $0xe8] sm:$0xff] }
 0x137   :  { %605 = vmatprep.subr.mxu1 %v369_v41  ;;  %v667_v41 = vld [vmem:[#allocation11 + $0x68] sm:$0xff] }
 0x138   :  { %606 = vmatpush1.msra.mxu1 %v368_v42  ;;  %v682_v42 = vld [vmem:[#allocation11 + $0xe0] sm:$0xff] }
 0x139   :  { %607 = vmatprep.subr.mxu1 %v365_v43  ;;  %v666_v43 = vld [vmem:[#allocation11 + $0x60] sm:$0xff] }
 0x13a   :  { %608 = vmatpush1.msra.mxu1 %v364_v44  ;;  %v681_v44 = vld [vmem:[#allocation11 + $0xd8] sm:$0xff] }
 0x13b   :  { %609 = vmatprep.subr.mxu1 %v361_v45  ;;  %v665_v45 = vld [vmem:[#allocation11 + $0x58] sm:$0xff] }
 0x13c   :  { %610 = vmatpush1.msra.mxu1 %v360_v46  ;;  %v680_v46 = vld [vmem:[#allocation11 + $0xd0] sm:$0xff] }
 0x13d   :  { %611 = vmatprep.subr.mxu1 %v485_v47  ;;  %v664_v47 = vld [vmem:[#allocation11 + $0x50] sm:$0xff] }
 0x13e   :  { %612 = vmatpush2.msra.mxu1 %v484_v48  ;;  %v679_v48 = vld [vmem:[#allocation11 + $0xc8] sm:$0xff] }
 0x13f   :  { %613 = vmatprep.subr.mxu1 %v481_v49  ;;  %v663_v49 = vld [vmem:[#allocation11 + $0x48] sm:$0xff] }
 0x140   :  { %614 = vmatpush2.msra.mxu1 %v480_v50  ;;  %v678_v50 = vld [vmem:[#allocation11 + $0xc0] sm:$0xff] }
 0x141   :  { %615 = vmatprep.subr.mxu1 %v477_v51  ;;  %v662_v51 = vld [vmem:[#allocation11 + $0x40] sm:$0xff] }
 0x142   :  { %616 = vmatpush2.msra.mxu1 %v476_v52  ;;  %v677_v52 = vld [vmem:[#allocation11 + $0xb8] sm:$0xff] }
 0x143   :  { %617 = vmatprep.subr.mxu1 %v473_v53  ;;  %v661_v53 = vld [vmem:[#allocation11 + $0x38] sm:$0xff] }
 0x144   :  { %618 = vmatpush2.msra.mxu1 %v472_v54  ;;  %v676_v54 = vld [vmem:[#allocation11 + $0xb0] sm:$0xff] }
 0x145   :  { %619 = vmatprep.subr.mxu1 %v469_v55  ;;  %v660_v55 = vld [vmem:[#allocation11 + $0x30] sm:$0xff] }
 0x146   :  { %620 = vmatpush2.msra.mxu1 %v468_v56  ;;  %v675_v56 = vld [vmem:[#allocation11 + $0xa8] sm:$0xff] }
 0x147   :  { %621 = vmatprep.subr.mxu1 %v465_v57  ;;  %v659_v57 = vld [vmem:[#allocation11 + $0x28] sm:$0xff] }
 0x148   :  { %622 = vmatpush2.msra.mxu1 %v464_v58  ;;  %v674_v58 = vld [vmem:[#allocation11 + $0xa0] sm:$0xff] }
 0x149   :  { %623 = vmatprep.subr.mxu1 %v461_v59  ;;  %v658_v59 = vld [vmem:[#allocation11 + $0x20] sm:$0xff] }
 0x14a   :  { %624 = vmatpush2.msra.mxu1 %v460_v60  ;;  %v673_v60 = vld [vmem:[#allocation11 + $0x98] sm:$0xff] }
 0x14b   :  { %625 = vmatprep.subr.mxu1 %v457_v61  ;;  %v657_v61 = vld [vmem:[#allocation11 + $0x18] sm:$0xff] }
 0x14c   :  { %626 = vmatpush2.msra.mxu1 %v456_v62  ;;  %v672_v62 = vld [vmem:[#allocation11 + $0x90] sm:$0xff] }
 0x14d   :  { %627 = vmatprep.subr.mxu1 %v453_v63  ;;  %v656_v63 = vld [vmem:[#allocation11 + $0x10] sm:$0xff] }
 0x14e   :  { %628 = vmatpush2.msra.mxu1 %v452_v0  ;;  %v671_v0 = vld [vmem:[#allocation11 + $0x88] sm:$0xff] }
 0x14f   :  { %629 = vmatprep.subr.mxu1 %v449_v1  ;;  %v655_v1 = vld [vmem:[#allocation11 + $0x8] sm:$0xff] }
 0x150   :  { %630 = vmatpush2.msra.mxu1 %v448_v2  ;;  %v670_v2 = vld [vmem:[#allocation11 + $0x80] sm:$0xff] }
 0x151   :  { %631 = vmatprep.subr.mxu1 %v445_v6  ;;  %v654_v6 = vld [vmem:[#allocation11] sm:$0xff] }
 0x152   :  { %632 = vmatpush2.msra.mxu1 %v444_v8  ;;  %v717_v8 = vld [vmem:[#allocation11 + $0x1f8] sm:$0xff] }
 0x153   :  { %633 = vmatprep.subr.mxu1 %v441_v9  ;;  %v1251_v9 = vld [vmem:[%s1280_s6] sm:$0xf] }
 0x154   :  { %634 = vmatpush2.msra.mxu1 %v440_v10  ;;  %v502_v10 = vsub.s32 3, %v1233_v4  ;;  %v491_v11 = vrot.slane %v1251_v9, %v1236_v5  ;;  %v700_v5 = vld [vmem:[#allocation11 + $0x170] sm:$0xff] }
 0x155   :  { %635 = vmatprep.subr.mxu1 %v437_v12  ;;  %v495_v12 = vrot.slane %v1251_v9, %v1242_v7  ;;  %v715_v7 = vld [vmem:[#allocation11 + $0x1e8] sm:$0xff] }
 0x156   :  { %636 = vmatpush2.msra.mxu1 %v436_v14  ;;  %v503_v13 = vrot.slane %v1251_v9, %v502_v10 }
 0x157   :  { %637 = vmatprep.subr.mxu1 %v433_v16 }
 0x158   :  { %638 = vmatpush2.msra.mxu1 %v432_v18 }
 0x159   :  { %639 = vmatprep.subr.mxu1 %v429_v20 }
 0x15a   :  { %640 = vmatpush2.msra.mxu1 %v428_v22 }
 0x15b   :  { %641 = vmatprep.subr.mxu1 %v425_v24 }
 0x15c   :  { %642 = vmatpush2.msra.mxu1 %v424_v26  ;;  %v699_v26 = vld [vmem:[#allocation11 + $0x168] sm:$0xff] }
 0x1dd   :  { %v351_v31 = vpop.f32.mrf.mxu1 }
 0x1de   :  { %v352_v32 = vadd.f32 %v351_v31, %v278_v29  ;;  %v713_v29 = vld [vmem:[#allocation11 + $0x1d8] sm:$0xff]  ;;  %v712_v31 = vld [vmem:[#allocation11 + $0x1d0] sm:$0xff] }
 0x1df   :  { %v353_v33 = vpop.f32.mrf.mxu1 }
 0x1e0   :  { %v356_v34 = vmax.f32 %v352_v32, 0.0  ;;  %v354_v35 = vadd.f32 %v353_v33, %v282_v30  ;;  %v697_v30 = vld [vmem:[#allocation11 + $0x158] sm:$0xff]  ;;  %v696_v32 = vld [vmem:[#allocation11 + $0x150] sm:$0xff]  ;;  %v711_v33 = vld [vmem:[#allocation11 + $0x1c8] sm:$0xff] }
 0x1e2   :  { %882 = vst [vmem:[#allocation13] sm:$0xff] %v356_v34  ;;  %v357_v36 = vmax.f32 %v354_v35, 0.0  ;;  %v710_v35 = vld [vmem:[#allocation11 + $0x1c0] sm:$0xff] }
 0x1e4   :  { %883 = vst [vmem:[#allocation13 + $0x8] sm:$0xff] %v357_v36  ;;  %572 = vmatprep.mubr.f32.mxu0 %v357_v36  ;;  %643 = vmatprep.mubr.f32.mxu1 %v357_v36  ;;  %v694_v36 = vld [vmem:[#allocation11 + $0x140] sm:$0xff] }
 0x1e5   :  { %573 = vmatmul.mubr.f32.vlgmr.msra.gmra.mxu0 %v356_v34  ;;  %644 = vmatmul.mubr.f32.vlgmr.msra.gmra.mxu1 %v356_v34  ;;  %v695_v34 = vld [vmem:[#allocation11 + $0x148] sm:$0xff] }
 0x1e6   :  { %907 = vmatpush3.msra.mxu0 %v669_v37  ;;  %v709_v37 = vld [vmem:[#allocation11 + $0x1b8] sm:$0xff] }
 0x1e7   :  { %908 = vmatprep.subr.mxu0 %v684_v38  ;;  %v693_v38 = vld [vmem:[#allocation11 + $0x138] sm:$0xff] }
 0x1e8   :  { %909 = vmatpush3.msra.mxu0 %v668_v39  ;;  %v708_v39 = vld [vmem:[#allocation11 + $0x1b0] sm:$0xff] }
 0x1e9   :  { %910 = vmatprep.subr.mxu0 %v683_v40  ;;  %v692_v40 = vld [vmem:[#allocation11 + $0x130] sm:$0xff] }
 0x1ea   :  { %911 = vmatpush3.msra.mxu0 %v667_v41  ;;  %v707_v41 = vld [vmem:[#allocation11 + $0x1a8] sm:$0xff] }
 0x1eb   :  { %912 = vmatprep.subr.mxu0 %v682_v42  ;;  %v498_v42 = vsub.s32 2, %v1233_v4 }
 0x1ec   :  { %913 = vmatpush3.msra.mxu0 %v666_v43  ;;  %v691_v43 = vld [vmem:[#allocation11 + $0x128] sm:$0xff] }
 0x1ed   :  { %914 = vmatprep.subr.mxu0 %v681_v44  ;;  %v706_v44 = vld [vmem:[#allocation11 + $0x1a0] sm:$0xff] }
 0x1ee   :  { %915 = vmatpush3.msra.mxu0 %v665_v45  ;;  %v690_v45 = vld [vmem:[#allocation11 + $0x120] sm:$0xff] }
 0x1ef   :  { %916 = vmatprep.subr.mxu0 %v680_v46  ;;  %v705_v46 = vld [vmem:[#allocation11 + $0x198] sm:$0xff] }
 0x1f0   :  { %917 = vmatpush3.msra.mxu0 %v664_v47  ;;  %v499_v47 = vrot.slane %v1251_v9, %v498_v42 }
 0x1f1   :  { %918 = vmatprep.subr.mxu0 %v679_v48  ;;  %v689_v48 = vld [vmem:[#allocation11 + $0x118] sm:$0xff] }
 0x1f2   :  { %919 = vmatpush3.msra.mxu0 %v663_v49  ;;  %v704_v49 = vld [vmem:[#allocation11 + $0x190] sm:$0xff] }
 0x1f3   :  { %920 = vmatprep.subr.mxu0 %v678_v50  ;;  %v688_v50 = vld [vmem:[#allocation11 + $0x110] sm:$0xff] }
 0x1f4   :  { %921 = vmatpush3.msra.mxu0 %v662_v51  ;;  %v703_v51 = vld [vmem:[#allocation11 + $0x188] sm:$0xff] }
 0x1f5   :  { %922 = vmatprep.subr.mxu0 %v677_v52  ;;  %v687_v52 = vld [vmem:[#allocation11 + $0x108] sm:$0xff] }
 0x1f6   :  { %923 = vmatpush3.msra.mxu0 %v661_v53  ;;  %v702_v53 = vld [vmem:[#allocation11 + $0x180] sm:$0xff] }
 0x1f7   :  { %924 = vmatprep.subr.mxu0 %v676_v54  ;;  %v686_v54 = vld [vmem:[#allocation11 + $0x100] sm:$0xff] }
 0x1f8   :  { %925 = vmatpush3.msra.mxu0 %v660_v55 }
 0x1f9   :  { %926 = vmatprep.subr.mxu0 %v675_v56 }
 0x1fa   :  { %927 = vmatpush3.msra.mxu0 %v659_v57 }
 0x1fb   :  { %928 = vmatprep.subr.mxu0 %v674_v58 }
 0x1fc   :  { %929 = vmatpush3.msra.mxu0 %v658_v59  ;;  %v905_v59 = vld [vmem:[%s1282_s8] ss:$0 sm:$0xff]  ;;  %s1157_s8 = smov [#allocation13]  }
 0x1fd   :  { %930 = vmatprep.subr.mxu0 %v673_v60  ;;  %s892_s22 = sshll.u32 %s1157_s8, 4  ;;  %s893_s22 = int_to_ptr.vmem [resolvable:$true] %s892_s22 }
 0x1fe   :  { %931 = vmatpush3.msra.mxu0 %v657_v61  ;;  %v866_v61 = vand.u32 127, %v122_v3  ;;  %s1114_s23 = scalar_lea.vmem %s893_s22, 384  ;;  %p1119_p3 = scmp.lt.s32.totalorder %s893_s22, %s893_s22 }
 0x1ff   :  { %932 = vmatprep.subr.mxu0 %v672_v62  ;;  %p1115_p2 = scmp.ne.s32.totalorder %s893_s22, %s1114_s23  ;;  %p1120_p4 = scmp.lt.s32.totalorder %s1114_s23, %s1114_s23 }
 0x200   :  { %933 = vmatpush3.msra.mxu0 %v656_v63  ;;  %vm867_vm1 = vcmp.lt.s32.totalorder %v866_v61, 4 }
 0x201   :  { %934 = vmatprep.subr.mxu0 %v671_v0  ;;  %p1121_p5 = por %p1120_p4, %p1119_p3 }
 0x202   :  { %935 = vmatpush3.msra.mxu0 %v655_v1 }
 0x203   :  { %936 = vmatprep.subr.mxu0 %v670_v2  ;;  %p1122_p6 = pnand %p1121_p5, %p1115_p2 }
 0x204   :  { %937 = vmatpush3.msra.mxu0 %v654_v6 }
 0x205   :  { %941 = vmatprep.subr.mxu0 %v717_v8 }
 0x2a5   :  { %v574_v14 = vpop.f32.mrf.mxu0  ;;  %v1259_v15 = vpop.f32.mrf.mxu1 }
 0x2a6   :  { %v575_v16 = vadd.f32 %v574_v14, %v491_v11  ;;  %v646_v4 = vadd.f32 %v1259_v15, %v499_v47 }
 0x2a7   :  { %v576_v17 = vpop.f32.mrf.mxu0  ;;  %v647_v18 = vpop.f32.mrf.mxu1 }
 0x2a8   :  { %v577_v19 = vadd.f32 %v576_v17, %v495_v12  ;;  %v648_v20 = vadd.f32 %v647_v18, %v503_v13  ;;  %v650_v22 = vmax.f32 %v575_v16, 0.0  ;;  %v652_v55 = vmax.f32 %v646_v4, 0.0 }
 0x2aa   :  { %v651_v21 = vmax.f32 %v577_v19, 0.0  ;;  %v653_v24 = vmax.f32 %v648_v20, 0.0 }
 0x2ac   :  { %789 = vmatprep.mubr.f32.mxu0 %v651_v21 }
 0x2ad   :  { %790 = vmatmul.mubr.f32.vlgmr.msra.gmra.mxu0 %v650_v22 }
 0x2ae   :  { %942 = vmatpush3.msra.mxu0 %v701_v23  ;;  %859 = vmatprep.mubr.f32.mxu0 %v653_v24 }
 0x2af   :  { %943 = vmatprep.subr.mxu0 %v716_v25 }
 0x2b0   :  { %944 = vmatpush3.msra.mxu0 %v700_v5 }
 0x2b1   :  { %945 = vmatprep.subr.mxu0 %v715_v7 }
 0x2b2   :  { %946 = vmatpush3.msra.mxu0 %v699_v26 }
 0x2b3   :  { %947 = vmatprep.subr.mxu0 %v714_v27 }
 0x2b4   :  { %948 = vmatpush3.msra.mxu0 %v698_v28 }
 0x2b5   :  { %949 = vmatprep.subr.mxu0 %v713_v29 }
 0x2b6   :  { %950 = vmatpush3.msra.mxu0 %v697_v30 }
 0x2b7   :  { %951 = vmatprep.subr.mxu0 %v712_v31 }
 0x2b8   :  { %952 = vmatpush3.msra.mxu0 %v696_v32 }
 0x2b9   :  { %953 = vmatprep.subr.mxu0 %v711_v33 }
 0x2ba   :  { %954 = vmatpush3.msra.mxu0 %v695_v34 }
 0x2bb   :  { %955 = vmatprep.subr.mxu0 %v710_v35 }
 0x2bc   :  { %956 = vmatpush3.msra.mxu0 %v694_v36 }
 0x2bd   :  { %957 = vmatprep.subr.mxu0 %v709_v37 }
 0x2be   :  { %958 = vmatpush3.msra.mxu0 %v693_v38 }
 0x2bf   :  { %959 = vmatprep.subr.mxu0 %v708_v39 }
 0x2c0   :  { %960 = vmatpush3.msra.mxu0 %v692_v40 }
 0x2c1   :  { %961 = vmatprep.subr.mxu0 %v707_v41 }
 0x2c2   :  { %962 = vmatpush3.msra.mxu0 %v691_v43 }
 0x2c3   :  { %963 = vmatprep.subr.mxu0 %v706_v44 }
 0x2c4   :  { %964 = vmatpush3.msra.mxu0 %v690_v45 }
 0x2c5   :  { %965 = vmatprep.subr.mxu0 %v705_v46 }
 0x2c6   :  { %966 = vmatpush3.msra.mxu0 %v689_v48 }
 0x2c7   :  { %967 = vmatprep.subr.mxu0 %v704_v49 }
 0x2c8   :  { %968 = vmatpush3.msra.mxu0 %v688_v50 }
 0x2c9   :  { %969 = vmatprep.subr.mxu0 %v703_v51 }
 0x2ca   :  { %970 = vmatpush3.msra.mxu0 %v687_v52 }
 0x2cb   :  { %971 = vmatprep.subr.mxu0 %v702_v53 }
 0x2cc   :  { %972 = vmatpush3.msra.mxu0 %v686_v54 }
 0x2cd   :  { %860 = vmatmul.mubr.f32.vlgmr.msra.gmra.mxu0 %v652_v55 }
 0x36d   :  { %v938_v56 = vpop.f32.mrf.mxu0 }
 0x36f   :  { %v939_v57 = vpop.f32.mrf.mxu0 }
 0x370   :  { %v940_v58 = vadd.f32 %v939_v57, %v938_v56 }
 0x372   :  { %v792_v63 = vadd.f32 %v940_v58, %v905_v59 }
 0x38d   :  { %v973_v60 = vpop.f32.mrf.mxu0 }
 0x38f   :  { %v974_v62 = vpop.f32.mrf.mxu0 }
 0x390   :  { %v975_v0 = vadd.f32 %v974_v62, %v973_v60 }
 0x392   :  { %v862_v1 = vadd.f32 %v975_v0, %v792_v63 }
 0x394   :  { %v868_v2 = vsel %vm867_vm1, %v862_v1, -1e+30 }
 0x395   :  { %869 = vmax.xlane.f32.xlu0 %v868_v2 }
 0x41e   :  { %v870_v6 = vpop.xlane.xlu0 %869 }
 0x41f   :  { %v871_v8 = vsub.f32 %v862_v1, %v870_v6 }
 0x421   :  { %v872_v9 = vmul.f32 1.442695, %v871_v8 }
 0x423   :  { %990 = vpow2.f32 %v872_v9 }
 0x430   :  { %v991_v10 = vpop.eup %990 }
 0x431   :  { %v874_v11 = vsel %vm867_vm1, %v991_v10, 0.0 }
 0x432   :  { %875 = vadd.xlane.f32.xlu0 %v874_v11 }
 0x4bb   :  { %v876_v12 = vpop.xlane.xlu0 %875 }
 0x4bc   :  { %992 = vrcp.f32 %v876_v12 }
 0x4c9   :  { %v993_v13 = vpop.eup %992 }
 0x4ca   :  { %v878_v3 = vmul.f32 %v993_v13, %v876_v12 }
 0x4cc   :  { %v879_v14 = vsub.f32 2.0, %v878_v3 }
 0x4ce   :  { %v880_v15 = vmul.f32 %v993_v13, %v879_v14 }
 0x4d0   :  { %v881_v16 = vmul.f32 %v880_v15, %v874_v11 }
 0x4d2   :  { %v884_v17 = vsel %vm867_vm1, %v881_v16, %v862_v1 }
 0x4d3   :  { %885 = vst [vmem:[#allocation13 + $0x10] sm:$0xff] %v884_v17 }
 0x4d4   :  { %1125 = shalt.err (!%p1122_p6)
}
 0x4d5   :  { %895 = dma.vmem_to_hbm [thread:$0]  %s893_s22, 384, %s1283_s9, [#allocation4]  }
 0x4d6   :  { %1142 = dma.done.wait [#allocation4], 384  }
 0x4d7   :  { %1143 = vsyncadd [#allocation4], 4294966912 }
 0x4d8   :  { %899 = vsyncpa [#allocation3], 1 }
 0x4d9   :  { %900 = vsyncpa [#allocation6], 1 }
 0x4da   :  { %901 = vsyncpa [#allocation9], 1 }
 0x4db   :  { %902 = vsyncpa [#allocation12], 1 }
 0x4dc   :  { %903 = vsyncpa [#allocation4], 1 }

</bundles_post_ra>
